<compile_context>
chip_gen: v7x
topology: tpu7x:2x2x1
jax: 0.10.0
libtpu: 0.0.40
codegen_flags: <defaults>
</compile_context>

<pallas_src>
from functools import partial

import jax
import jax.numpy as jnp
from jax.experimental import pallas as pl
from jax.experimental.pallas import tpu as pltpu


# ----------------------------------------------------------------------------
# Fused kernel: SpatialGate + ChannelGate (+MLP) + fuse + 1x1 proj, TB images/step.
# ----------------------------------------------------------------------------
def fre_refine_kernel(low_ref, high_ref, wc_max_ref, wc_mean_ref,
                      w1t_ref, w2t_ref, wp_ref, bp_ref, out_ref):
    """low/high: (TB, C, HW) f32; wc_max/wc_mean: (HW, HW) Toeplitz halves
    (matmul dtype); w1t: (C, hid); w2t: (hid, C); wp: (C_out, C) matmul dtype;
    bp: (C_out, 1) f32; out: (TB, C_out, HW) f32."""
    tb = low_ref.shape[0]
    mm_dtype = wc_max_ref.dtype

    low = low_ref[...]                                       # (TB, C, HW) f32
    high = high_ref[...]                                     # (TB, C, HW) f32

    # --- SpatialGate(high): channel max/mean (sublane reduce) + 7x7 conv -----
    # conv = cmax @ M_max + cmean @ M_mean   (two lane-dense MXU matmuls, M=TB)
    cmax = jnp.max(high, axis=1)                             # (TB, HW)
    cmean = jnp.mean(high, axis=1)                           # (TB, HW)
    conv = (jnp.dot(cmax.astype(mm_dtype), wc_max_ref[...],
                    preferred_element_type=jnp.float32)
            + jnp.dot(cmean.astype(mm_dtype), wc_mean_ref[...],
                      preferred_element_type=jnp.float32))   # (TB, HW) f32
    spatial_w = jax.nn.sigmoid(conv)                         # (TB, HW) f32

    # --- ChannelGate(low): avg/max pool (lane reduce) + one fused MLP pass ---
    avg = jnp.mean(low, axis=2)                              # (TB, C)
    mx = jnp.max(low, axis=2)                                # (TB, C)
    pooled = jnp.concatenate([avg, mx], axis=0)              # (2*TB, C) f32
    h = jnp.maximum(
        jnp.dot(pooled, w1t_ref[...], preferred_element_type=jnp.float32), 0.0)
    g = jnp.dot(h, w2t_ref[...], preferred_element_type=jnp.float32)  # (2*TB, C)
    channel_w = jax.nn.sigmoid(g[:tb] + g[tb:])              # (TB, C) f32

    # --- fuse (f32 elementwise) + 1x1 projection per image (lane-dense MXU) --
    fused = low * spatial_w[:, None, :] + high * channel_w[:, :, None]  # (TB,C,HW)
    wp = wp_ref[...]                                         # (C_out, C)
    bp = bp_ref[...]                                         # (C_out, 1) f32
    for t in range(tb):                                      # static, TB is tiny
        y = jnp.dot(wp, fused[t].astype(wp.dtype),
                    preferred_element_type=jnp.float32) + bp
        out_ref[t] = y.astype(out_ref.dtype)                 # (C_out, HW) store


# ----------------------------------------------------------------------------
# Host-side weight preprocessing: 7x7 zero-padded conv -> two dense matrices.
# ----------------------------------------------------------------------------
def _spatial_conv_as_matrices(w_spatial, H, W):
    """Expand (1, 2, 7, 7) conv weights (padding=3) into two (H*W, H*W) matrices
    M_c with  M_c[(yy*W+xx), (y*W+x)] = w[0, c, yy-y+3, xx-x+3]  for |yy-y|<=3,
    |xx-x|<=3 (else 0), so that  conv_flat = cmax_flat @ M_0 + cmean_flat @ M_1."""
    HW = H * W
    w = w_spatial.reshape(2, 7, 7).astype(jnp.float32)
    dy = jnp.arange(H)[:, None] - jnp.arange(H)[None, :]     # (yy, y)
    dx = jnp.arange(W)[:, None] - jnp.arange(W)[None, :]     # (xx, x)
    vy = (jnp.abs(dy) <= 3).astype(jnp.float32)
    vx = (jnp.abs(dx) <= 3).astype(jnp.float32)
    ky = jnp.clip(dy + 3, 0, 6)
    kx = jnp.clip(dx + 3, 0, 6)
    mats = []
    for c in range(2):
        wc = w[c][ky[:, :, None, None], kx[None, None, :, :]]   # (yy, y, xx, x)
        wc = wc * vy[:, :, None, None] * vx[None, None, :, :]
        wc = wc.transpose(0, 2, 1, 3).reshape(HW, HW)           # (yy*W+xx, y*W+x)
        mats.append(wc)
    return mats[0], mats[1]


def _grid_steps_for_batch(B: int) -> int:
    """2 equal chunks when the chip has 2 TensorCores (v7x / megacore) and the
    batch splits evenly; otherwise one big step (v5e/v6e are single-TC)."""
    if B % 2 != 0:
        return 1
    try:
        kind = jax.devices()[0].device_kind.lower()
    except Exception:
        return 1
    return 2 if any(k in kind for k in ("v7", "v4", "v5p")) else 1


def _const2d(shape):
    """Constant-weight BlockSpec: fetched once, single-buffered (no wasted VMEM)."""
    return pl.BlockSpec(shape, lambda b: (0, 0), pipeline_mode=pl.Buffered(1))


# ----------------------------------------------------------------------------
# Wrapper
# ----------------------------------------------------------------------------
@partial(jax.jit, static_argnames=("matmul_dtype",))
def fre_refine(low_nchw, high_nchw, params, matmul_dtype=jnp.bfloat16):
    B, C, H, W = low_nchw.shape
    HW = H * W
    c_out, c_in = params["w_proj"].shape[:2]
    if c_in != C:
        raise ValueError("w_proj input channels must match the feature channels")
    hid = params["w_mlp1"].shape[0]

    grid_steps = _grid_steps_for_batch(B)
    TB = B // grid_steps

    low = low_nchw.reshape(B, C, HW).astype(jnp.float32)      # free reshape (NCHW)
    high = high_nchw.reshape(B, C, HW).astype(jnp.float32)

    wc_max, wc_mean = _spatial_conv_as_matrices(params["w_spatial"], H, W)
    wc_max = wc_max.astype(matmul_dtype)                      # (HW, HW)
    wc_mean = wc_mean.astype(matmul_dtype)                    # (HW, HW)
    w1t = params["w_mlp1"].astype(jnp.float32).T              # (C, hid)
    w2t = params["w_mlp2"].astype(jnp.float32).T              # (hid, C)
    wp = params["w_proj"].reshape(c_out, c_in).astype(matmul_dtype)
    bp = params["b_proj"].reshape(c_out, 1).astype(jnp.float32)

    # Explicit scoped-VMEM sizing (keeps compiling on v5e's 16 MiB default,
    # stays under v7x's 64 MiB physical VMEM).
    mm_item = jnp.dtype(matmul_dtype).itemsize
    vmem_bytes = (2 * HW * HW * mm_item                       # Toeplitz halves (x1 buffer)
                  + 2 * 2 * TB * C * HW * 4                   # low/high, double-buffered
                  + 2 * TB * c_out * HW * 4                   # out, double-buffered
                  + (2 * hid * C + c_out * C + c_out) * 4)    # small weights
    vmem_limit = int(min(56 * 1024 * 1024, max(16 * 1024 * 1024, 2 * vmem_bytes)))

    out = pl.pallas_call(
        fre_refine_kernel,
        out_shape=jax.ShapeDtypeStruct((B, c_out, HW), jnp.float32),
        grid=(grid_steps,),
        in_specs=[
            pl.BlockSpec((TB, C, HW), lambda b: (b, 0, 0)),   # low
            pl.BlockSpec((TB, C, HW), lambda b: (b, 0, 0)),   # high
            _const2d((HW, HW)),                               # conv matrix (max map)
            _const2d((HW, HW)),                               # conv matrix (mean map)
            _const2d((C, hid)),                               # mlp w1^T
            _const2d((hid, C)),                               # mlp w2^T
            _const2d((c_out, C)),                             # proj weight
            _const2d((c_out, 1)),                             # proj bias
        ],
        out_specs=pl.BlockSpec((TB, c_out, HW), lambda b: (b, 0, 0)),
        compiler_params=pltpu.CompilerParams(
            dimension_semantics=("parallel",),                # both TCs busy on v7x
            vmem_limit_bytes=vmem_limit,
        ),
    )(low, high, wc_max, wc_mean, w1t, w2t, wp, bp)

    return out.reshape(B, c_out, H, W)                        # back to NCHW, free


# ----------------------------------------------------------------------------
# Pure-JAX reference (mirrors the PyTorch forward exactly, NCHW)
# ----------------------------------------------------------------------------
def fre_refine_ref(low, high, params):
    B, C, H, W = low.shape
    # SpatialGate(high)
    cmax = jnp.max(high, axis=1, keepdims=True)
    cmean = jnp.mean(high, axis=1, keepdims=True)
    s = jnp.concatenate([cmax, cmean], axis=1)                # (B,2,H,W)
    sp = jnp.pad(s, ((0, 0), (0, 0), (3, 3), (3, 3)))
    w = params["w_spatial"]                                   # (1,2,7,7)
    acc = jnp.zeros((B, 1, H, W), jnp.float32)
    for c in range(2):
        for dy in range(7):
            for dx in range(7):
                acc = acc + w[0, c, dy, dx] * sp[:, c:c + 1, dy:dy + H, dx:dx + W]
    spatial_w = jax.nn.sigmoid(acc)
    # ChannelGate(low)
    avg = jnp.mean(low, axis=(2, 3))
    mx = jnp.max(low, axis=(2, 3))
    w1, w2 = params["w_mlp1"], params["w_mlp2"]

    def mlp(v):
        return jnp.maximum(v @ w1.T, 0.0) @ w2.T

    channel_w = jax.nn.sigmoid(mlp(avg) + mlp(mx))[:, :, None, None]
    # fuse + proj
    fused = low * spatial_w + high * channel_w
    c_out = params["w_proj"].shape[0]
    wp = params["w_proj"].reshape(c_out, C)
    out = jnp.einsum("bchw,oc->bohw", fused, wp) + params["b_proj"][None, :, None, None]
    return out


# ----------------------------------------------------------------------------
if __name__ == "__main__":
    B, C, H, W = 2, 32, 16, 16   # dim=32 so dim//16 = 2 in the channel MLP
    hid = C // 16

    key = jax.random.PRNGKey(0)
    k = jax.random.split(key, 7)
    low = jax.random.normal(k[0], (B, C, H, W), jnp.float32)
    high = jax.random.normal(k[1], (B, C, H, W), jnp.float32)

    params = {
        "w_spatial": 0.1 * jax.random.normal(k[2], (1, 2, 7, 7), jnp.float32),
        "w_mlp1":    0.1 * jax.random.normal(k[3], (hid, C), jnp.float32),
        "w_mlp2":    0.1 * jax.random.normal(k[4], (C, hid), jnp.float32),
        "w_proj":    0.1 * jax.random.normal(k[5], (C, C, 1, 1), jnp.float32),
        "b_proj":    0.1 * jax.random.normal(k[6], (C,), jnp.float32),
    }

    ref = jax.block_until_ready(fre_refine_ref(low, high, params))

    # Tight check of the fused-kernel math with f32 MXU operands.
    out_f32 = jax.block_until_ready(
        fre_refine(low, high, params, matmul_dtype=jnp.float32))
    assert out_f32.shape == (B, C, H, W)
    assert jnp.allclose(out_f32, ref, atol=2e-3, rtol=2e-3), \
        float(jnp.max(jnp.abs(out_f32 - ref)))

    # Default fast path: bf16 conv/proj MXU operands (f32 accumulation + f32
    # elementwise); tolerance sized for bf16 operand rounding.
    out = jax.block_until_ready(fre_refine(low, high, params))
    assert out.shape == (B, C, H, W)
    assert jnp.allclose(out, ref, atol=5e-2, rtol=5e-2), \
        float(jnp.max(jnp.abs(out - ref)))

    print("KERNEL_OK")
</pallas_src>

<mosaic_0001>
module attributes {stable_mosaic.version = 11 : i64} {
  func.func @fre_refine_kernel(%arg0: i32, %arg1: memref<2x32x256xf32, #tpu.memory_space<vmem>>, %arg2: memref<2x32x256xf32, #tpu.memory_space<vmem>>, %arg3: memref<256x256xf32, #tpu.memory_space<vmem>>, %arg4: memref<256x256xf32, #tpu.memory_space<vmem>>, %arg5: memref<32x2xf32, #tpu.memory_space<vmem>>, %arg6: memref<2x32xf32, #tpu.memory_space<vmem>>, %arg7: memref<32x32xf32, #tpu.memory_space<vmem>>, %arg8: memref<32x1xf32, #tpu.memory_space<vmem>>, %arg9: memref<2x32x256xf32, #tpu.memory_space<vmem>>) attributes {dimension_semantics = [#tpu.dimension_semantics<parallel>], iteration_bounds = array<i64: 1>, scalar_prefetch = 0 : i64, scratch_operands = 0 : i64, tpu.core_type = #tpu.core_type<tc>, window_params = [{transform_indices = @transform_0, window_bounds = array<i64: 2, 32, 256>}, {transform_indices = @transform_1, window_bounds = array<i64: 2, 32, 256>}, {pipeline_mode = #tpu.pipeline_mode<synchronous>, transform_indices = @transform_2, window_bounds = array<i64: 256, 256>}, {pipeline_mode = #tpu.pipeline_mode<synchronous>, transform_indices = @transform_3, window_bounds = array<i64: 256, 256>}, {pipeline_mode = #tpu.pipeline_mode<synchronous>, transform_indices = @transform_4, window_bounds = array<i64: 32, 2>}, {pipeline_mode = #tpu.pipeline_mode<synchronous>, transform_indices = @transform_5, window_bounds = array<i64: 2, 32>}, {pipeline_mode = #tpu.pipeline_mode<synchronous>, transform_indices = @transform_6, window_bounds = array<i64: 32, 32>}, {pipeline_mode = #tpu.pipeline_mode<synchronous>, transform_indices = @transform_7, window_bounds = array<i64: 32, 1>}, {transform_indices = @transform_8, window_bounds = array<i64: 2, 32, 256>}]} {
    %c0 = arith.constant 0 : index
    %c0_0 = arith.constant 0 : index
    %c0_1 = arith.constant 0 : index
    %0 = vector.load %arg1[%c0, %c0_0, %c0_1] : memref<2x32x256xf32, #tpu.memory_space<vmem>>, vector<2x32x256xf32>
    %c0_2 = arith.constant 0 : index
    %c0_3 = arith.constant 0 : index
    %c0_4 = arith.constant 0 : index
    %1 = vector.load %arg2[%c0_2, %c0_3, %c0_4] : memref<2x32x256xf32, #tpu.memory_space<vmem>>, vector<2x32x256xf32>
    %cst = arith.constant dense<0xFF800000> : vector<2x256xf32>
    %2 = vector.multi_reduction <maximumf>, %1, %cst [1] : vector<2x32x256xf32> to vector<2x256xf32>
    %cst_5 = arith.constant dense<0.000000e+00> : vector<2x256xf32>
    %3 = vector.multi_reduction <add>, %1, %cst_5 [1] : vector<2x32x256xf32> to vector<2x256xf32>
    %cst_6 = arith.constant 3.200000e+01 : f32
    %4 = vector.broadcast %cst_6 : f32 to vector<2x256xf32>
    %5 = arith.divf %3, %4 : vector<2x256xf32>
    %c0_7 = arith.constant 0 : index
    %c0_8 = arith.constant 0 : index
    %6 = vector.load %arg3[%c0_7, %c0_8] : memref<256x256xf32, #tpu.memory_space<vmem>>, vector<256x256xf32>
    %cst_9 = arith.constant dense<0.000000e+00> : vector<2x256xf32>
    %7 = tpu.matmul %2, %6, %cst_9 {dimension_numbers = #tpu.dot_dimension_numbers<[1], [0], [0], [1], [0, 0, 1, 1], [], []>} : vector<2x256xf32>, vector<256x256xf32>, vector<2x256xf32> -> vector<2x256xf32>
    %c0_10 = arith.constant 0 : index
    %c0_11 = arith.constant 0 : index
    %8 = vector.load %arg4[%c0_10, %c0_11] : memref<256x256xf32, #tpu.memory_space<vmem>>, vector<256x256xf32>
    %cst_12 = arith.constant dense<0.000000e+00> : vector<2x256xf32>
    %9 = tpu.matmul %5, %8, %cst_12 {dimension_numbers = #tpu.dot_dimension_numbers<[1], [0], [0], [1], [0, 0, 1, 1], [], []>} : vector<2x256xf32>, vector<256x256xf32>, vector<2x256xf32> -> vector<2x256xf32>
    %10 = arith.addf %7, %9 : vector<2x256xf32>
    %11 = arith.negf %10 : vector<2x256xf32>
    %12 = math.exp %11 : vector<2x256xf32>
    %cst_13 = arith.constant 1.000000e+00 : f32
    %13 = vector.broadcast %cst_13 : f32 to vector<2x256xf32>
    %14 = arith.addf %13, %12 : vector<2x256xf32>
    %15 = arith.divf %13, %14 : vector<2x256xf32>
    %cst_14 = arith.constant dense<0.000000e+00> : vector<2x32xf32>
    %16 = vector.multi_reduction <add>, %0, %cst_14 [2] : vector<2x32x256xf32> to vector<2x32xf32>
    %cst_15 = arith.constant 2.560000e+02 : f32
    %17 = vector.broadcast %cst_15 : f32 to vector<2x32xf32>
    %18 = arith.divf %16, %17 : vector<2x32xf32>
    %cst_16 = arith.constant dense<0xFF800000> : vector<2x32xf32>
    %19 = vector.multi_reduction <maximumf>, %0, %cst_16 [2] : vector<2x32x256xf32> to vector<2x32xf32>
    %20 = tpu.concatenate %18, %19 in 0 : vector<2x32xf32>, vector<2x32xf32> -> vector<4x32xf32>
    %c0_17 = arith.constant 0 : index
    %c0_18 = arith.constant 0 : index
    %21 = vector.load %arg5[%c0_17, %c0_18] : memref<32x2xf32, #tpu.memory_space<vmem>>, vector<32x2xf32>
    %cst_19 = arith.constant dense<0.000000e+00> : vector<4x2xf32>
    %22 = tpu.matmul %20, %21, %cst_19 {dimension_numbers = #tpu.dot_dimension_numbers<[1], [0], [0], [1], [0, 0, 1, 1], [], []>} : vector<4x32xf32>, vector<32x2xf32>, vector<4x2xf32> -> vector<4x2xf32>
    %cst_20 = arith.constant 0.000000e+00 : f32
    %23 = vector.broadcast %cst_20 : f32 to vector<4x2xf32>
    %24 = arith.maximumf %22, %23 : vector<4x2xf32>
    %c0_21 = arith.constant 0 : index
    %c0_22 = arith.constant 0 : index
    %25 = vector.load %arg6[%c0_21, %c0_22] : memref<2x32xf32, #tpu.memory_space<vmem>>, vector<2x32xf32>
    %cst_23 = arith.constant dense<0.000000e+00> : vector<4x32xf32>
    %26 = tpu.matmul %24, %25, %cst_23 {dimension_numbers = #tpu.dot_dimension_numbers<[1], [0], [0], [1], [0, 0, 1, 1], [], []>} : vector<4x2xf32>, vector<2x32xf32>, vector<4x32xf32> -> vector<4x32xf32>
    %27 = vector.extract_strided_slice %26 {offsets = [0, 0], sizes = [2, 32], strides = [1, 1]} : vector<4x32xf32> to vector<2x32xf32>
    %28 = vector.extract_strided_slice %26 {offsets = [2, 0], sizes = [2, 32], strides = [1, 1]} : vector<4x32xf32> to vector<2x32xf32>
    %29 = arith.addf %27, %28 : vector<2x32xf32>
    %30 = arith.negf %29 : vector<2x32xf32>
    %31 = math.exp %30 : vector<2x32xf32>
    %cst_24 = arith.constant 1.000000e+00 : f32
    %32 = vector.broadcast %cst_24 : f32 to vector<2x32xf32>
    %33 = arith.addf %32, %31 : vector<2x32xf32>
    %34 = arith.divf %32, %33 : vector<2x32xf32>
    %35 = vector.shape_cast %15 : vector<2x256xf32> to vector<2x1x256xf32>
    %36 = vector.broadcast %35 : vector<2x1x256xf32> to vector<2x32x256xf32>
    %37 = arith.mulf %0, %36 : vector<2x32x256xf32>
    %38 = vector.shape_cast %34 : vector<2x32xf32> to vector<2x32x1xf32>
    %39 = vector.broadcast %38 : vector<2x32x1xf32> to vector<2x32x256xf32>
    %40 = arith.mulf %1, %39 : vector<2x32x256xf32>
    %41 = arith.addf %37, %40 : vector<2x32x256xf32>
    %c0_25 = arith.constant 0 : index
    %c0_26 = arith.constant 0 : index
    %42 = vector.load %arg7[%c0_25, %c0_26] : memref<32x32xf32, #tpu.memory_space<vmem>>, vector<32x32xf32>
    %c0_27 = arith.constant 0 : index
    %c0_28 = arith.constant 0 : index
    %43 = vector.load %arg8[%c0_27, %c0_28] : memref<32x1xf32, #tpu.memory_space<vmem>>, vector<32x1xf32>
    %44 = vector.extract_strided_slice %41 {offsets = [0, 0, 0], sizes = [1, 32, 256], strides = [1, 1, 1]} : vector<2x32x256xf32> to vector<1x32x256xf32>
    %45 = vector.shape_cast %44 : vector<1x32x256xf32> to vector<32x256xf32>
    %cst_29 = arith.constant dense<0.000000e+00> : vector<32x256xf32>
    %46 = tpu.matmul %42, %45, %cst_29 {dimension_numbers = #tpu.dot_dimension_numbers<[1], [0], [0], [1], [0, 0, 1, 1], [], []>} : vector<32x32xf32>, vector<32x256xf32>, vector<32x256xf32> -> vector<32x256xf32>
    %47 = vector.broadcast %43 : vector<32x1xf32> to vector<32x256xf32>
    %48 = arith.addf %46, %47 : vector<32x256xf32>
    %c0_30 = arith.constant 0 : index
    %c0_31 = arith.constant 0 : index
    %c0_32 = arith.constant 0 : index
    %49 = vector.load %arg9[%c0_30, %c0_31, %c0_32] : memref<2x32x256xf32, #tpu.memory_space<vmem>>, vector<1x32x256xf32>
    %50 = vector.shape_cast %49 : vector<1x32x256xf32> to vector<32x256xf32>
    %51 = vector.shape_cast %48 : vector<32x256xf32> to vector<1x32x256xf32>
    tpu.vector_store %arg9[%c0_30, %c0_31, %c0_32], %51 {strides = array<i32>} : memref<2x32x256xf32, #tpu.memory_space<vmem>>, vector<1x32x256xf32>,
    %52 = vector.extract_strided_slice %41 {offsets = [1, 0, 0], sizes = [1, 32, 256], strides = [1, 1, 1]} : vector<2x32x256xf32> to vector<1x32x256xf32>
    %53 = vector.shape_cast %52 : vector<1x32x256xf32> to vector<32x256xf32>
    %cst_33 = arith.constant dense<0.000000e+00> : vector<32x256xf32>
    %54 = tpu.matmul %42, %53, %cst_33 {dimension_numbers = #tpu.dot_dimension_numbers<[1], [0], [0], [1], [0, 0, 1, 1], [], []>} : vector<32x32xf32>, vector<32x256xf32>, vector<32x256xf32> -> vector<32x256xf32>
    %55 = vector.broadcast %43 : vector<32x1xf32> to vector<32x256xf32>
    %56 = arith.addf %54, %55 : vector<32x256xf32>
    %c1 = arith.constant 1 : index
    %c0_34 = arith.constant 0 : index
    %c0_35 = arith.constant 0 : index
    %57 = vector.load %arg9[%c1, %c0_34, %c0_35] : memref<2x32x256xf32, #tpu.memory_space<vmem>>, vector<1x32x256xf32>
    %58 = vector.shape_cast %57 : vector<1x32x256xf32> to vector<32x256xf32>
    %59 = vector.shape_cast %56 : vector<32x256xf32> to vector<1x32x256xf32>
    tpu.vector_store %arg9[%c1, %c0_34, %c0_35], %59 {strides = array<i32>} : memref<2x32x256xf32, #tpu.memory_space<vmem>>, vector<1x32x256xf32>,
    return
  }
  func.func @transform_0(%arg0: i32) -> (i32, i32, i32) {
    %c0_i32 = arith.constant 0 : i32
    %c0_i32_0 = arith.constant 0 : i32
    %c0_i32_1 = arith.constant 0 : i32
    return %arg0, %c0_i32, %c0_i32_0 : i32, i32, i32
  }
  func.func @transform_1(%arg0: i32) -> (i32, i32, i32) {
    %c0_i32 = arith.constant 0 : i32
    %c0_i32_0 = arith.constant 0 : i32
    %c0_i32_1 = arith.constant 0 : i32
    return %arg0, %c0_i32, %c0_i32_0 : i32, i32, i32
  }
  func.func @transform_2(%arg0: i32) -> (i32, i32) {
    %c0_i32 = arith.constant 0 : i32
    %c0_i32_0 = arith.constant 0 : i32
    %c0_i32_1 = arith.constant 0 : i32
    return %c0_i32, %c0_i32_0 : i32, i32
  }
  func.func @transform_3(%arg0: i32) -> (i32, i32) {
    %c0_i32 = arith.constant 0 : i32
    %c0_i32_0 = arith.constant 0 : i32
    %c0_i32_1 = arith.constant 0 : i32
    return %c0_i32, %c0_i32_0 : i32, i32
  }
  func.func @transform_4(%arg0: i32) -> (i32, i32) {
    %c0_i32 = arith.constant 0 : i32
    %c0_i32_0 = arith.constant 0 : i32
    %c0_i32_1 = arith.constant 0 : i32
    return %c0_i32, %c0_i32_0 : i32, i32
  }
  func.func @transform_5(%arg0: i32) -> (i32, i32) {
    %c0_i32 = arith.constant 0 : i32
    %c0_i32_0 = arith.constant 0 : i32
    %c0_i32_1 = arith.constant 0 : i32
    return %c0_i32, %c0_i32_0 : i32, i32
  }
  func.func @transform_6(%arg0: i32) -> (i32, i32) {
    %c0_i32 = arith.constant 0 : i32
    %c0_i32_0 = arith.constant 0 : i32
    %c0_i32_1 = arith.constant 0 : i32
    return %c0_i32, %c0_i32_0 : i32, i32
  }
  func.func @transform_7(%arg0: i32) -> (i32, i32) {
    %c0_i32 = arith.constant 0 : i32
    %c0_i32_0 = arith.constant 0 : i32
    %c0_i32_1 = arith.constant 0 : i32
    return %c0_i32, %c0_i32_0 : i32, i32
  }
  func.func @transform_8(%arg0: i32) -> (i32, i32, i32) {
    %c0_i32 = arith.constant 0 : i32
    %c0_i32_0 = arith.constant 0 : i32
    %c0_i32_1 = arith.constant 0 : i32
    return %arg0, %c0_i32, %c0_i32_0 : i32, i32, i32
  }
}

</mosaic_0001>

<bundles_post_ra>
// kernel: fre_refine.1
= control target key start
LH: loop header
LB: loop body
LE: loop exit
PB: predicated region body
PF: predicated region fallthrough
CT: control target
= control target key end

     0   :  { %vm270_vm0 = vcmask 1041409   ;;  %vm1372_vm1 = vmmov 0   ;;  %vm513_vm2 = vcmask 130112   ;;  %vm520_vm3 = vcmask 195712   ;;  %s2435_s0 = inlined_call_operand.vmem [shape: f32[2,32,256], index: 0, kind: input, shape index: {}]   ;;  %s2436_s3 = inlined_call_operand.vmem [shape: f32[256,256], index: 3, kind: input, shape index: {}]   ;;  %s2437_s2 = inlined_call_operand.vmem [shape: f32[256,256], index: 2, kind: input, shape index: {}]   ;;  %s2438_s1 = inlined_call_operand.vmem [shape: f32[2,32,256], index: 1, kind: input, shape index: {}]   ;;  %s2439_s4 = inlined_call_operand.vmem [shape: f32[32,2], index: 4, kind: input, shape index: {}]   ;;  %s2440_s5 = inlined_call_operand.vmem [shape: f32[2,32], index: 5, kind: input, shape index: {}]   ;;  %s2441_s7 = inlined_call_operand.vmem [shape: f32[32,1], index: 7, kind: input, shape index: {}]   ;;  %s2442_s6 = inlined_call_operand.vmem [shape: f32[32,32], index: 6, kind: input, shape index: {}]   ;;  %s2443_s8 = inlined_call_operand.vmem [shape: f32[2,32,256], index: 8, kind: output, shape index: {}]  }
   0x1   :  { %v1423_v0 = vld [vmem:[%s2435_s0 + $0x40] sm:$0xff]  ;;  %v1428_v1 = vld [vmem:[%s2435_s0 + $0x48] sm:$0xff]  ;;  %v1445_v5 = vld [vmem:[%s2435_s0 + $0x50] sm:$0xff]  ;;  %vm527_vm4 = vcmask 261312   ;;  %vm596_vm5 = vcmask 1043459   ;;  %vm599_vm6 = vcmask 1041408  }
   0x2   :  { %v1433_v2 = vld [vmem:[%s2435_s0] sm:$0xff]  ;;  %v449_v3 = vadd.f32 %v1428_v1, %v1423_v0  ;;  %v1440_v4 = vld [vmem:[%s2435_s0 + $0x8] sm:$0xff]  ;;  %v1450_v6 = vld [vmem:[%s2435_s0 + $0x58] sm:$0xff]  ;;  %vm605_vm7 = vcmask 261120   ;;  %vm681_vm8 = vcmask 15360  }
   0x3   :  { %v437_v7 = vadd.f32 %v1440_v4, %v1433_v2  ;;  %v1457_v8 = vld [vmem:[%s2435_s0 + $0x10] sm:$0xff]  ;;  %v1462_v9 = vld [vmem:[%s2435_s0 + $0x18] sm:$0xff]  ;;  %v452_v10 = vadd.f32 %v1450_v6, %v1445_v5  ;;  %v1471_v12 = vld [vmem:[%s2435_s0 + $0x60] sm:$0xff] }
   0x4   :  { %450 = vadd.xlane.f32.xlu1 %v449_v3  ;;  %v440_v11 = vadd.f32 %v1462_v9, %v1457_v8  ;;  %v1476_v13 = vld [vmem:[%s2435_s0 + $0x68] sm:$0xff]  ;;  %v1481_v14 = vld [vmem:[%s2435_s0 + $0x20] sm:$0xff]  ;;  %v205_v17 = vld [vmem:[%s2436_s3 + $0x18] sm:$0xff] }
   0x5   :  { %438 = vadd.xlane.f32.xlu0 %v437_v7  ;;  %v1486_v15 = vld [vmem:[%s2435_s0 + $0x28] sm:$0xff]  ;;  %v1497_v18 = vld [vmem:[%s2435_s0 + $0x70] sm:$0xff]  ;;  %v1502_v19 = vld [vmem:[%s2435_s0 + $0x78] sm:$0xff]  ;;  %v455_v24 = vadd.f32 %v1476_v13, %v1471_v12  ;;  %v473_v7 = vmax.f32 %v1457_v8, %v1462_v9 }
   0x6   :  { %v203_v16 = vld [vmem:[%s2436_s3 + $0x8] sm:$0xff]  ;;  %v141_v22 = vld [vmem:[%s2437_s2 + $0x18] sm:$0xff]  ;;  %v202_v23 = vld [vmem:[%s2436_s3] sm:$0xff]  ;;  %v443_v31 = vadd.f32 %v1486_v15, %v1481_v14  ;;  %v458_v46 = vadd.f32 %v1502_v19, %v1497_v18 }
   0x7   :  { %v1183_v20 = vpack.c.bf16 %v205_v17, %v203_v16  ;;  %v139_v21 = vld [vmem:[%s2437_s2 + $0x8] sm:$0xff]  ;;  %v1518_v25 = vld [vmem:[%s2435_s0 + $0x30] sm:$0xff]  ;;  %v1523_v26 = vld [vmem:[%s2435_s0 + $0x38] sm:$0xff] }
   0x8   :  { %453 = vadd.xlane.f32.xlu1 %v452_v10  ;;  %v1247_v27 = vpack.c.bf16 %v141_v22, %v139_v21  ;;  %v204_v28 = vld [vmem:[%s2436_s3 + $0x10] sm:$0xff]  ;;  %v138_v29 = vld [vmem:[%s2437_s2] sm:$0xff]  ;;  %v207_v34 = vld [vmem:[%s2436_s3 + $0x28] sm:$0xff]  ;;  %v446_v51 = vadd.f32 %v1523_v26, %v1518_v25 }
   0x9   :  { %v140_v30 = vld [vmem:[%s2437_s2 + $0x10] sm:$0xff]  ;;  %441 = vadd.xlane.f32.xlu0 %v440_v11  ;;  %1184 = vmatprep.subr.bf16.mxu1 %v1183_v20  ;;  %v1185_v32 = vpack.c.bf16 %v204_v28, %v202_v23  ;;  %v209_v35 = vld [vmem:[%s2436_s3 + $0x38] sm:$0xff]  ;;  %v143_v36 = vld [vmem:[%s2437_s2 + $0x28] sm:$0xff]  ;;  %v470_v20 = vmax.f32 %v1433_v2, %v1440_v4 }
   0xa   :  { %v1249_v33 = vpack.c.bf16 %v140_v30, %v138_v29  ;;  %1248 = vmatprep.subr.bf16.mxu0 %v1247_v27  ;;  %v1187_v37 = vpack.c.bf16 %v209_v35, %v207_v34  ;;  %v145_v38 = vld [vmem:[%s2437_s2 + $0x38] sm:$0xff]  ;;  %v206_v39 = vld [vmem:[%s2436_s3 + $0x20] sm:$0xff]  ;;  %v208_v40 = vld [vmem:[%s2436_s3 + $0x30] sm:$0xff]  ;;  %v485_v27 = vmax.f32 %v1445_v5, %v1450_v6 }
   0xb   :  { %1186 = vmatpush1.bf16.msra.mxu1 %v1185_v32  ;;  %v1251_v41 = vpack.c.bf16 %v145_v38, %v143_v36  ;;  %v1189_v42 = vpack.c.bf16 %v208_v40, %v206_v39  ;;  %v142_v43 = vld [vmem:[%s2437_s2 + $0x20] sm:$0xff]  ;;  %v144_v44 = vld [vmem:[%s2437_s2 + $0x30] sm:$0xff]  ;;  %v211_v45 = vld [vmem:[%s2436_s3 + $0x48] sm:$0xff]  ;;  %v482_v32 = vmax.f32 %v1423_v0, %v1428_v1 }
   0xc   :  { %1250 = vmatpush1.bf16.msra.mxu0 %v1249_v33  ;;  %456 = vadd.xlane.f32.xlu1 %v455_v24  ;;  %v1253_v47 = vpack.c.bf16 %v144_v44, %v142_v43  ;;  %v213_v48 = vld [vmem:[%s2436_s3 + $0x58] sm:$0xff]  ;;  %v147_v49 = vld [vmem:[%s2437_s2 + $0x48] sm:$0xff]  ;;  %v210_v54 = vld [vmem:[%s2436_s3 + $0x40] sm:$0xff] }
   0xd   :  { %1188 = vmatprep.subr.bf16.mxu1 %v1187_v37  ;;  %v149_v50 = vld [vmem:[%s2437_s2 + $0x58] sm:$0xff]  ;;  %444 = vadd.xlane.f32.xlu0 %v443_v31  ;;  %v1191_v52 = vpack.c.bf16 %v213_v48, %v211_v45  ;;  %v212_v55 = vld [vmem:[%s2436_s3 + $0x50] sm:$0xff]  ;;  %v146_v56 = vld [vmem:[%s2437_s2 + $0x40] sm:$0xff]  ;;  %v488_v37 = vmax.f32 %v1471_v12, %v1476_v13  ;;  %v491_v48 = vmax.f32 %v1497_v18, %v1502_v19 }
   0xe   :  { %1252 = vmatprep.subr.bf16.mxu0 %v1251_v41  ;;  %v1255_v53 = vpack.c.bf16 %v149_v50, %v147_v49  ;;  %v148_v57 = vld [vmem:[%s2437_s2 + $0x50] sm:$0xff]  ;;  %v215_v58 = vld [vmem:[%s2436_s3 + $0x68] sm:$0xff]  ;;  %v217_v59 = vld [vmem:[%s2436_s3 + $0x78] sm:$0xff]  ;;  %v1193_v60 = vpack.c.bf16 %v212_v55, %v210_v54 }
   0xf   :  { %1190 = vmatpush1.bf16.msra.mxu1 %v1189_v42  ;;  %v1257_v61 = vpack.c.bf16 %v148_v57, %v146_v56  ;;  %v151_v62 = vld [vmem:[%s2437_s2 + $0x68] sm:$0xff]  ;;  %v153_v63 = vld [vmem:[%s2437_s2 + $0x78] sm:$0xff]  ;;  %v214_v3 = vld [vmem:[%s2436_s3 + $0x60] sm:$0xff]  ;;  %v1195_v10 = vpack.c.bf16 %v217_v59, %v215_v58  ;;  %v476_v42 = vmax.f32 %v1481_v14, %v1486_v15 }
  0x10   :  { %1254 = vmatpush1.bf16.msra.mxu0 %v1253_v47  ;;  %459 = vadd.xlane.f32.xlu1 %v458_v46  ;;  %v216_v11 = vld [vmem:[%s2436_s3 + $0x70] sm:$0xff]  ;;  %v150_v16 = vld [vmem:[%s2437_s2 + $0x60] sm:$0xff]  ;;  %v1259_v8 = vpack.c.bf16 %v153_v63, %v151_v62  ;;  %v219_v9 = vld [vmem:[%s2436_s3 + $0x88] sm:$0xff] }
  0x11   :  { %1192 = vmatprep.subr.bf16.mxu1 %v1191_v52  ;;  %v152_v17 = vld [vmem:[%s2437_s2 + $0x70] sm:$0xff]  ;;  %447 = vadd.xlane.f32.xlu0 %v446_v51  ;;  %v221_v21 = vld [vmem:[%s2436_s3 + $0x98] sm:$0xff]  ;;  %v155_v22 = vld [vmem:[%s2437_s2 + $0x88] sm:$0xff]  ;;  %v1197_v2 = vpack.c.bf16 %v216_v11, %v214_v3 }
  0x12   :  { %1256 = vmatprep.subr.bf16.mxu0 %v1255_v53  ;;  %v157_v23 = vld [vmem:[%s2437_s2 + $0x98] sm:$0xff]  ;;  %v1261_v4 = vpack.c.bf16 %v152_v17, %v150_v16  ;;  %v218_v24 = vld [vmem:[%s2436_s3 + $0x80] sm:$0xff]  ;;  %v1199_v28 = vpack.c.bf16 %v221_v21, %v219_v9  ;;  %v220_v29 = vld [vmem:[%s2436_s3 + $0x90] sm:$0xff]  ;;  %v479_v53 = vmax.f32 %v1518_v25, %v1523_v26 }
  0x13   :  { %1194 = vmatpush1.bf16.msra.mxu1 %v1193_v60  ;;  %v154_v30 = vld [vmem:[%s2437_s2 + $0x80] sm:$0xff]  ;;  %v156_v31 = vld [vmem:[%s2437_s2 + $0x90] sm:$0xff]  ;;  %v1263_v5 = vpack.c.bf16 %v157_v23, %v155_v22  ;;  %v223_v6 = vld [vmem:[%s2436_s3 + $0xa8] sm:$0xff]  ;;  %v1201_v0 = vpack.c.bf16 %v220_v29, %v218_v24 }
  0x14   :  { %1258 = vmatpush1.bf16.msra.mxu0 %v1257_v61  ;;  %474 = vmax.xlane.f32.xlu1 %v473_v7  ;;  %v225_v33 = vld [vmem:[%s2436_s3 + $0xb8] sm:$0xff]  ;;  %v159_v34 = vld [vmem:[%s2437_s2 + $0xa8] sm:$0xff]  ;;  %v1265_v1 = vpack.c.bf16 %v156_v31, %v154_v30  ;;  %v222_v36 = vld [vmem:[%s2436_s3 + $0xa0] sm:$0xff] }
  0x15   :  { %1196 = vmatprep.subr.bf16.mxu1 %v1195_v10  ;;  %471 = vmax.xlane.f32.xlu0 %v470_v20  ;;  %v161_v35 = vld [vmem:[%s2437_s2 + $0xb8] sm:$0xff]  ;;  %v1203_v38 = vpack.c.bf16 %v225_v33, %v223_v6  ;;  %v224_v39 = vld [vmem:[%s2436_s3 + $0xb0] sm:$0xff]  ;;  %v158_v40 = vld [vmem:[%s2437_s2 + $0xa0] sm:$0xff] }
  0x16   :  { %1260 = vmatprep.subr.bf16.mxu0 %v1259_v8  ;;  %v160_v41 = vld [vmem:[%s2437_s2 + $0xb0] sm:$0xff]  ;;  %v1267_v12 = vpack.c.bf16 %v161_v35, %v159_v34  ;;  %v227_v13 = vld [vmem:[%s2436_s3 + $0xc8] sm:$0xff]  ;;  %v229_v43 = vld [vmem:[%s2436_s3 + $0xd8] sm:$0xff]  ;;  %v1205_v14 = vpack.c.bf16 %v224_v39, %v222_v36 }
  0x17   :  { %1198 = vmatpush1.bf16.msra.mxu1 %v1197_v2  ;;  %v163_v44 = vld [vmem:[%s2437_s2 + $0xc8] sm:$0xff]  ;;  %v165_v45 = vld [vmem:[%s2437_s2 + $0xd8] sm:$0xff]  ;;  %v1269_v15 = vpack.c.bf16 %v160_v41, %v158_v40  ;;  %v226_v46 = vld [vmem:[%s2436_s3 + $0xc0] sm:$0xff]  ;;  %v1207_v49 = vpack.c.bf16 %v229_v43, %v227_v13 }
  0x18   :  { %1262 = vmatpush1.bf16.msra.mxu0 %v1261_v4  ;;  %486 = vmax.xlane.f32.xlu1 %v485_v27  ;;  %v228_v47 = vld [vmem:[%s2436_s3 + $0xd0] sm:$0xff]  ;;  %v162_v50 = vld [vmem:[%s2437_s2 + $0xc0] sm:$0xff]  ;;  %v231_v52 = vld [vmem:[%s2436_s3 + $0xe8] sm:$0xff]  ;;  %v1271_v18 = vpack.c.bf16 %v165_v45, %v163_v44 }
  0x19   :  { %1200 = vmatprep.subr.bf16.mxu1 %v1199_v28  ;;  %483 = vmax.xlane.f32.xlu0 %v482_v32  ;;  %v164_v51 = vld [vmem:[%s2437_s2 + $0xd0] sm:$0xff]  ;;  %v233_v19 = vld [vmem:[%s2436_s3 + $0xf8] sm:$0xff]  ;;  %v167_v54 = vld [vmem:[%s2437_s2 + $0xe8] sm:$0xff]  ;;  %v1209_v56 = vpack.c.bf16 %v228_v47, %v226_v46 }
  0x1a   :  { %1264 = vmatprep.subr.bf16.mxu0 %v1263_v5  ;;  %v169_v55 = vld [vmem:[%s2437_s2 + $0xf8] sm:$0xff]  ;;  %v1273_v57 = vpack.c.bf16 %v164_v51, %v162_v50  ;;  %v230_v25 = vld [vmem:[%s2436_s3 + $0xe0] sm:$0xff]  ;;  %v232_v26 = vld [vmem:[%s2436_s3 + $0xf0] sm:$0xff]  ;;  %v1211_v58 = vpack.c.bf16 %v233_v19, %v231_v52 }
  0x1b   :  { %1202 = vmatpush1.bf16.msra.mxu1 %v1201_v0  ;;  %v1275_v59 = vpack.c.bf16 %v169_v55, %v167_v54  ;;  %v166_v60 = vld [vmem:[%s2437_s2 + $0xe0] sm:$0xff]  ;;  %v168_v61 = vld [vmem:[%s2437_s2 + $0xf0] sm:$0xff]  ;;  %v235_v62 = vld [vmem:[%s2436_s3 + $0x108] sm:$0xff]  ;;  %v1213_v10 = vpack.c.bf16 %v232_v26, %v230_v25 }
  0x1c   :  { %1266 = vmatpush1.bf16.msra.mxu0 %v1265_v1  ;;  %489 = vmax.xlane.f32.xlu1 %v488_v37  ;;  %v237_v63 = vld [vmem:[%s2436_s3 + $0x118] sm:$0xff]  ;;  %v171_v3 = vld [vmem:[%s2437_s2 + $0x108] sm:$0xff]  ;;  %v1277_v11 = vpack.c.bf16 %v168_v61, %v166_v60  ;;  %v234_v16 = vld [vmem:[%s2436_s3 + $0x100] sm:$0xff] }
  0x1d   :  { %1204 = vmatprep.subr.bf16.mxu1 %v1203_v38  ;;  %477 = vmax.xlane.f32.xlu0 %v476_v42  ;;  %v173_v7 = vld [vmem:[%s2437_s2 + $0x118] sm:$0xff]  ;;  %v236_v17 = vld [vmem:[%s2436_s3 + $0x110] sm:$0xff]  ;;  %v1215_v20 = vpack.c.bf16 %v237_v63, %v235_v62  ;;  %v170_v9 = vld [vmem:[%s2437_s2 + $0x100] sm:$0xff] }
  0x1e   :  { %1268 = vmatprep.subr.bf16.mxu0 %v1267_v12  ;;  %v1279_v8 = vpack.c.bf16 %v173_v7, %v171_v3  ;;  %v172_v21 = vld [vmem:[%s2437_s2 + $0x110] sm:$0xff]  ;;  %v239_v22 = vld [vmem:[%s2436_s3 + $0x128] sm:$0xff]  ;;  %v241_v23 = vld [vmem:[%s2436_s3 + $0x138] sm:$0xff]  ;;  %v1217_v30 = vpack.c.bf16 %v236_v17, %v234_v16 }
  0x1f   :  { %1206 = vmatpush1.bf16.msra.mxu1 %v1205_v14  ;;  %v175_v2 = vld [vmem:[%s2437_s2 + $0x128] sm:$0xff]  ;;  %v177_v4 = vld [vmem:[%s2437_s2 + $0x138] sm:$0xff]  ;;  %v1763_v24 = vld [vmem:[%s2436_s3 + $0x120] sm:$0xff]  ;;  %v1281_v31 = vpack.c.bf16 %v172_v21, %v170_v9  ;;  %v1219_v34 = vpack.c.bf16 %v241_v23, %v239_v22 }
  0x20   :  { %1270 = vmatpush1.bf16.msra.mxu0 %v1269_v15  ;;  %492 = vmax.xlane.f32.xlu1 %v491_v48  ;;  %v1768_v27 = vld [vmem:[%s2436_s3 + $0x130] sm:$0xff]  ;;  %v1773_v28 = vld [vmem:[%s2437_s2 + $0x120] sm:$0xff]  ;;  %v1783_v32 = vld [vmem:[%s2436_s3 + $0x148] sm:$0xff]  ;;  %v1283_v35 = vpack.c.bf16 %v177_v4, %v175_v2 }
  0x21   :  { %1208 = vmatprep.subr.bf16.mxu1 %v1207_v49  ;;  %480 = vmax.xlane.f32.xlu0 %v479_v53  ;;  %v1778_v29 = vld [vmem:[%s2437_s2 + $0x130] sm:$0xff]  ;;  %v1788_v5 = vld [vmem:[%s2436_s3 + $0x158] sm:$0xff]  ;;  %v1793_v6 = vld [vmem:[%s2437_s2 + $0x148] sm:$0xff]  ;;  %v1221_v52 = vpack.c.bf16 %v1768_v27, %v1763_v24 }
  0x22   :  { %1272 = vmatprep.subr.bf16.mxu0 %v1271_v18  ;;  %v1798_v33 = vld [vmem:[%s2437_s2 + $0x158] sm:$0xff]  ;;  %v1803_v0 = vld [vmem:[%s2436_s3 + $0x140] sm:$0xff]  ;;  %v1808_v1 = vld [vmem:[%s2436_s3 + $0x150] sm:$0xff]  ;;  %v1285_v53 = vpack.c.bf16 %v1778_v29, %v1773_v28  ;;  %v1223_v25 = vpack.c.bf16 %v1788_v5, %v1783_v32 }
  0x23   :  { %1210 = vmatpush1.bf16.msra.mxu1 %v1209_v56  ;;  %v1813_v36 = vld [vmem:[%s2437_s2 + $0x140] sm:$0xff]  ;;  %v1818_v37 = vld [vmem:[%s2437_s2 + $0x150] sm:$0xff]  ;;  %v1823_v38 = vld [vmem:[%s2436_s3 + $0x168] sm:$0xff]  ;;  %v1287_v26 = vpack.c.bf16 %v1798_v33, %v1793_v6  ;;  %v1225_v62 = vpack.c.bf16 %v1808_v1, %v1803_v0 }
  0x24   :  { %1274 = vmatpush1.bf16.msra.mxu0 %v1273_v57  ;;  %1212 = vmatprep.subr.bf16.mxu1 %v1211_v58  ;;  %v1828_v39 = vld [vmem:[%s2436_s3 + $0x178] sm:$0xff]  ;;  %v1833_v40 = vld [vmem:[%s2437_s2 + $0x168] sm:$0xff]  ;;  %v1843_v42 = vld [vmem:[%s2436_s3 + $0x160] sm:$0xff]  ;;  %v1289_v63 = vpack.c.bf16 %v1818_v37, %v1813_v36 }
  0x25   :  { %1276 = vmatprep.subr.bf16.mxu0 %v1275_v59  ;;  %v1838_v41 = vld [vmem:[%s2437_s2 + $0x178] sm:$0xff]  ;;  %v1848_v12 = vld [vmem:[%s2436_s3 + $0x170] sm:$0xff]  ;;  %v1853_v13 = vld [vmem:[%s2437_s2 + $0x160] sm:$0xff]  ;;  %v1227_v3 = vpack.c.bf16 %v1828_v39, %v1823_v38 }
  0x26   :  { %v1858_v43 = vld [vmem:[%s2437_s2 + $0x170] sm:$0xff]  ;;  %v1863_v44 = vld [vmem:[%s2436_s3 + $0x188] sm:$0xff]  ;;  %v1868_v45 = vld [vmem:[%s2436_s3 + $0x198] sm:$0xff]  ;;  %v1291_v7 = vpack.c.bf16 %v1838_v41, %v1833_v40  ;;  %v1229_v17 = vpack.c.bf16 %v1848_v12, %v1843_v42 }
  0x27   :  { %1214 = vmatpush1.bf16.msra.mxu1 %v1213_v10  ;;  %v1873_v14 = vld [vmem:[%s2437_s2 + $0x188] sm:$0xff]  ;;  %v1878_v15 = vld [vmem:[%s2437_s2 + $0x198] sm:$0xff]  ;;  %v1883_v46 = vld [vmem:[%s2436_s3 + $0x180] sm:$0xff] }
  0x28   :  { %1278 = vmatpush1.bf16.msra.mxu0 %v1277_v11  ;;  %1216 = vmatprep.subr.bf16.mxu1 %v1215_v20  ;;  %v1888_v47 = vld [vmem:[%s2436_s3 + $0x190] sm:$0xff]  ;;  %v1893_v48 = vld [vmem:[%s2437_s2 + $0x180] sm:$0xff]  ;;  %v1903_v50 = vld [vmem:[%s2436_s3 + $0x1a8] sm:$0xff]  ;;  %v1293_v20 = vpack.c.bf16 %v1858_v43, %v1853_v13  ;;  %v2453_v42 = vpack.c.bf16 %v1878_v15, %v1873_v14 }
  0x29   :  { %1280 = vmatprep.subr.bf16.mxu0 %v1279_v8  ;;  %v1898_v49 = vld [vmem:[%s2437_s2 + $0x190] sm:$0xff]  ;;  %v1908_v51 = vld [vmem:[%s2436_s3 + $0x1b8] sm:$0xff]  ;;  %v1917_v18 = vld [vmem:[%s2437_s2 + $0x1a8] sm:$0xff]  ;;  %v2454_v14 = vpack.c.bf16 %v1888_v47, %v1883_v46 }
  0x2a   :  { %v1922_v19 = vld [vmem:[%s2437_s2 + $0x1b8] sm:$0xff]  ;;  %v1927_v54 = vld [vmem:[%s2436_s3 + $0x1a0] sm:$0xff]  ;;  %v1932_v55 = vld [vmem:[%s2436_s3 + $0x1b0] sm:$0xff]  ;;  %v2455_v15 = vpack.c.bf16 %v1898_v49, %v1893_v48 }
  0x2b   :  { %1218 = vmatpush1.bf16.msra.mxu1 %v1217_v30  ;;  %v1937_v56 = vld [vmem:[%s2437_s2 + $0x1a0] sm:$0xff]  ;;  %v1942_v57 = vld [vmem:[%s2437_s2 + $0x1b0] sm:$0xff]  ;;  %v1951_v58 = vld [vmem:[%s2436_s3 + $0x1c8] sm:$0xff] }
  0x2c   :  { %1282 = vmatpush1.bf16.msra.mxu0 %v1281_v31  ;;  %1220 = vmatprep.subr.bf16.mxu1 %v1219_v34  ;;  %v1956_v59 = vld [vmem:[%s2436_s3 + $0x1d8] sm:$0xff]  ;;  %v1961_v60 = vld [vmem:[%s2437_s2 + $0x1c8] sm:$0xff]  ;;  %v1979_v10 = vld [vmem:[%s2436_s3 + $0x1c0] sm:$0xff] }
  0x2d   :  { %1284 = vmatprep.subr.bf16.mxu0 %v1283_v35  ;;  %v1966_v61 = vld [vmem:[%s2437_s2 + $0x1d8] sm:$0xff]  ;;  %v1984_v11 = vld [vmem:[%s2436_s3 + $0x1d0] sm:$0xff]  ;;  %v1989_v16 = vld [vmem:[%s2437_s2 + $0x1c0] sm:$0xff] }
  0x2e   :  { %v2002_v21 = vld [vmem:[%s2437_s2 + $0x1d0] sm:$0xff]  ;;  %v2007_v22 = vld [vmem:[%s2436_s3 + $0x1e8] sm:$0xff]  ;;  %v2012_v23 = vld [vmem:[%s2436_s3 + $0x1f8] sm:$0xff] }
  0x2f   :  { %1222 = vmatpush1.bf16.msra.mxu1 %v1221_v52  ;;  %v2023_v27 = vld [vmem:[%s2437_s2 + $0x1e8] sm:$0xff]  ;;  %v2028_v28 = vld [vmem:[%s2437_s2 + $0x1f8] sm:$0xff]  ;;  %v2033_v29 = vld [vmem:[%s2436_s3 + $0x1e0] sm:$0xff] }
  0x30   :  { %1286 = vmatpush1.bf16.msra.mxu0 %v1285_v53  ;;  %1224 = vmatprep.subr.bf16.mxu1 %v1223_v25  ;;  %v2044_v5 = vld [vmem:[%s2436_s3 + $0x1f0] sm:$0xff]  ;;  %v2049_v6 = vld [vmem:[%s2437_s2 + $0x1e0] sm:$0xff]  ;;  %v2067_v36 = vld [vmem:[%s2438_s1 + $0x8] sm:$0xff] }
  0x31   :  { %1288 = vmatprep.subr.bf16.mxu0 %v1287_v26  ;;  %v2054_v33 = vld [vmem:[%s2437_s2 + $0x1f0] sm:$0xff]  ;;  %v2072_v37 = vld [vmem:[%s2438_s1 + $0x18] sm:$0xff]  ;;  %v2077_v38 = vld [vmem:[%s2438_s1 + $0x28] sm:$0xff] }
  0x32   :  { %2448 = vst [vmem:[#allocation2_spill] sm:$0xff] %v2077_v38  ;;  %v2086_v41 = vld [vmem:[%s2438_s1 + $0x48] sm:$0xff]  ;;  %v2091_v52 = vld [vmem:[%s2438_s1 + $0x58] sm:$0xff]  ;;  %v106_v53 = vadd.f32 %v2072_v37, %v2067_v36  ;;  %v70_v25 = vmax.f32 %v2067_v36, %v2072_v37  ;;  %v2130_v32 = vld [vmem:[%s2438_s1 + $0x10] sm:$0xff] }
  0x33   :  { %1226 = vmatpush1.bf16.msra.mxu1 %v1225_v62  ;;  %v2102_v40 = vld [vmem:[%s2438_s1 + $0x38] sm:$0xff]  ;;  %v2107_v39 = vld [vmem:[%s2438_s1 + $0x68] sm:$0xff]  ;;  %v124_v1 = vadd.f32 %v2091_v52, %v2086_v41  ;;  %v88_v62 = vmax.f32 %v2086_v41, %v2091_v52  ;;  %v2152_v31 = vld [vmem:[%s2438_s1 + $0x60] sm:$0xff] }
  0x34   :  { %1290 = vmatpush1.bf16.msra.mxu0 %v1289_v63  ;;  %2449 = vst [vmem:[#allocation3_spill] sm:$0xff] %v2102_v40  ;;  %2450 = vst [vmem:[#allocation4_spill] sm:$0xff] %v2107_v39  ;;  %v2116_v63 = vld [vmem:[%s2438_s1] sm:$0xff]  ;;  %1228 = vmatprep.subr.bf16.mxu1 %v1227_v3  ;;  %v2123_v0 = vld [vmem:[%s2438_s1 + $0x78] sm:$0xff]  ;;  %v107_v35 = vadd.f32 %v106_v53, %v2077_v38  ;;  %v71_v34 = vmax.f32 %v70_v25, %v2077_v38 }
  0x35   :  { %1292 = vmatprep.subr.bf16.mxu0 %v1291_v7  ;;  %2451 = vst [vmem:[#allocation5_spill] sm:$0xff] %v2123_v0  ;;  %v2135_v3 = vld [vmem:[%s2438_s1 + $0x20] sm:$0xff]  ;;  %v125_v7 = vadd.f32 %v124_v1, %v2107_v39  ;;  %v89_v26 = vmax.f32 %v88_v62, %v2107_v39  ;;  %v2147_v25 = vld [vmem:[%s2438_s1 + $0x50] sm:$0xff]  ;;  %v97_v1 = vadd.f32 %v2130_v32, %v2116_v63 }
  0x36   :  { %v2142_v53 = vld [vmem:[%s2438_s1 + $0x40] sm:$0xff]  ;;  %v61_v62 = vmax.f32 %v2116_v63, %v2130_v32  ;;  %v108_v30 = vadd.f32 %v107_v35, %v2102_v40  ;;  %v72_v24 = vmax.f32 %v71_v34, %v2102_v40  ;;  %v2163_v4 = vld [vmem:[%s2438_s1 + $0x30] sm:$0xff]  ;;  %v2452_v40 = vpack.c.bf16 %v1868_v45, %v1863_v44 }
  0x37   :  { %v115_v2 = vadd.f32 %v2147_v25, %v2142_v53  ;;  %v79_v9 = vmax.f32 %v2142_v53, %v2147_v25  ;;  %1230 = vmatpush1.bf16.msra.mxu1 %v1229_v17  ;;  %v126_v34 = vadd.f32 %v125_v7, %v2123_v0  ;;  %v90_v35 = vmax.f32 %v89_v26, %v2123_v0  ;;  %v2180_v8 = vld [vmem:[%s2438_s1 + $0x70] sm:$0xff] }
  0x38   :  { %1294 = vmatpush1.bf16.msra.mxu0 %v1293_v20  ;;  %v98_v39 = vadd.f32 %v97_v1, %v2135_v3  ;;  %1232 = vmatprep.subr.bf16.mxu1 %v2452_v40  ;;  %v109_v12 = vrot.slane %v108_v30, 4  ;;  %v73_v13 = vrot.slane %v72_v24, 4  ;;  %v62_v17 = vmax.f32 %v61_v62, %v2135_v3 }
  0x39   :  { %1296 = vmatprep.subr.bf16.mxu0 %v2453_v42  ;;  %v116_v43 = vadd.f32 %v115_v2, %v2152_v31  ;;  %v127_v20 = vrot.slane %v126_v34, 4  ;;  %v91_v26 = vrot.slane %v90_v35, 4  ;;  %v80_v1 = vmax.f32 %v79_v9, %v2152_v31 }
  0x3a   :  { %v99_v7 = vadd.f32 %v98_v39, %v2163_v4  ;;  %v110_v0 = vadd.f32 %v109_v12, %v108_v30  ;;  %v74_v38 = vmax.f32 %v72_v24, %v73_v13  ;;  %v63_v45 = vmax.f32 %v62_v17, %v2163_v4 }
  0x3b   :  { %v117_v44 = vadd.f32 %v116_v43, %v2180_v8  ;;  %1234 = vmatpush1.bf16.msra.mxu1 %v2454_v14  ;;  %v128_v2 = vadd.f32 %v127_v20, %v126_v34  ;;  %v92_v40 = vmax.f32 %v90_v35, %v91_v26  ;;  %v81_v39 = vmax.f32 %v80_v1, %v2180_v8 }
  0x3c   :  { %1298 = vmatpush1.bf16.msra.mxu0 %v2455_v15  ;;  %v100_v62 = vrot.slane %v99_v7, 4  ;;  %v2456_v9 = vpack.c.bf16 %v1908_v51, %v1903_v50  ;;  %v2457_v24 = vpack.c.bf16 %v1922_v19, %v1917_v18  ;;  %v111_v30 = vrot.slane %v110_v0, 2 }
  0x3d   :  { %v75_v46 = vrot.slane %v74_v38, 2  ;;  %v118_v47 = vrot.slane %v117_v44, 4  ;;  %v64_v42 = vrot.slane %v63_v45, 4  ;;  %v129_v48 = vrot.slane %v128_v2, 2 }
  0x3e   :  { %1236 = vmatprep.subr.bf16.mxu1 %v2456_v9  ;;  %1300 = vmatprep.subr.bf16.mxu0 %v2457_v24  ;;  %v93_v49 = vrot.slane %v92_v40, 2  ;;  %v101_v34 = vadd.f32 %v100_v62, %v99_v7  ;;  %v82_v35 = vrot.slane %v81_v39, 4  ;;  %v112_v12 = vadd.f32 %v111_v30, %v110_v0 }
  0x3f   :  { %v76_v13 = vmax.f32 %v74_v38, %v75_v46  ;;  %v119_v43 = vadd.f32 %v118_v47, %v117_v44  ;;  %v65_v17 = vmax.f32 %v63_v45, %v64_v42  ;;  %v2458_v50 = vpack.c.bf16 %v1932_v55, %v1927_v54 }
  0x40   :  { %v2459_v51 = vpack.c.bf16 %v1942_v57, %v1937_v56  ;;  %v130_v18 = vadd.f32 %v129_v48, %v128_v2  ;;  %v94_v19 = vmax.f32 %v92_v40, %v93_v49  ;;  %v102_v20 = vrot.slane %v101_v34, 2 }
  0x41   :  { %1238 = vmatpush1.bf16.msra.mxu1 %v2458_v50  ;;  %v83_v26 = vmax.f32 %v81_v39, %v82_v35  ;;  %v2460_v7 = vpack.c.bf16 %v1956_v59, %v1951_v58  ;;  %v2461_v0 = vpack.c.bf16 %v1966_v61, %v1961_v60  ;;  %v113_v38 = vrot.slane %v112_v12, 1 }
  0x42   :  { %1302 = vmatpush1.bf16.msra.mxu0 %v2459_v51  ;;  %v77_v1 = vrot.slane %v76_v13, 1  ;;  %v120_v54 = vrot.slane %v119_v43, 2  ;;  %v66_v55 = vrot.slane %v65_v17, 2  ;;  %v131_v44 = vrot.slane %v130_v18, 1 }
  0x43   :  { %1240 = vmatprep.subr.bf16.mxu1 %v2460_v7  ;;  %1304 = vmatprep.subr.bf16.mxu0 %v2461_v0  ;;  %v95_v45 = vrot.slane %v94_v19, 1  ;;  %v103_v56 = vadd.f32 %v102_v20, %v101_v34  ;;  %v84_v57 = vrot.slane %v83_v26, 2  ;;  %v114_v14 = vadd.f32 %v113_v38, %v112_v12 }
  0x44   :  { %v78_v15 = vmax.f32 %v76_v13, %v77_v1  ;;  %v121_v2 = vadd.f32 %v120_v54, %v119_v43  ;;  %v67_v40 = vmax.f32 %v65_v17, %v66_v55  ;;  %v2462_v58 = vpack.c.bf16 %v1984_v11, %v1979_v10  ;;  %v601_v11 = vld [vmem:[%s2439_s4] sm:$0xff]  ;;  %v603_v17 = vld [vmem:[%s2439_s4 + $0x10] sm:$0xff] }
  0x45   :  { %v2463_v59 = vpack.c.bf16 %v2002_v21, %v1989_v16  ;;  %v132_v60 = vadd.f32 %v131_v44, %v130_v18  ;;  %v96_v61 = vmax.f32 %v94_v19, %v95_v45  ;;  %v104_v62 = vrot.slane %v103_v56, 1  ;;  %v602_v16 = vld [vmem:[%s2439_s4 + $0x8] sm:$0xff] }
  0x46   :  { %1242 = vmatpush1.bf16.msra.mxu1 %v2462_v58  ;;  %v85_v39 = vmax.f32 %v83_v26, %v84_v57  ;;  %v2464_v9 = vpack.c.bf16 %v2012_v23, %v2007_v22  ;;  %v2465_v24 = vpack.c.bf16 %v2028_v28, %v2023_v27  ;;  %v135_v30 = vmul.f32 0.03125, %v114_v14 }
  0x47   :  { %1306 = vmatpush1.bf16.msra.mxu0 %v2463_v59  ;;  %v122_v46 = vrot.slane %v121_v2, 1  ;;  %v68_v10 = vrot.slane %v67_v40, 1  ;;  %v137_v21 = vmul.f32 0.03125, %v132_v60  ;;  %v351_v47 = vsel %vm270_vm0, %v96_v61, %v78_v15 }
  0x48   :  { %1244 = vmatprep.subr.bf16.mxu1 %v2464_v9  ;;  %1308 = vmatprep.subr.bf16.mxu0 %v2465_v24  ;;  %v105_v22 = vadd.f32 %v104_v62, %v103_v56  ;;  %v86_v23 = vrot.slane %v85_v39, 1  ;;  %v2466_v28 = vpack.c.bf16 %v2044_v5, %v2033_v29  ;;  %v2467_v48 = vpack.c.bf16 %v2054_v33, %v2049_v6  ;;  %v604_v29 = vld [vmem:[%s2439_s4 + $0x18] sm:$0xff] }
  0x49   :  { %418 = vmatprep.mubr.f32.mxu0 %v351_v47  ;;  %v123_v42 = vadd.f32 %v122_v46, %v121_v2  ;;  %v69_v27 = vmax.f32 %v67_v40, %v68_v10  ;;  %v272_v49 = vsel %vm270_vm0, %v137_v21, %v135_v30  ;;  %v1312_v12 = vpack.c.bf16 %v602_v16, %v601_v11 }
  0x4a   :  { %1246 = vmatpush1.bf16.msra.mxu1 %v2466_v28  ;;  %v134_v34 = vmul.f32 0.03125, %v105_v22  ;;  %v87_v35 = vmax.f32 %v85_v39, %v86_v23  ;;  %339 = vmatprep.mubr.f32.mxu1 %v272_v49  ;;  %v1370_v43 = vmov 0.0|0.0   ;;  %v1371_v6 = vmov 0.0  }
  0x4b   :  { %1310 = vmatpush1.bf16.msra.mxu0 %v2467_v48  ;;  %v136_v13 = vmul.f32 0.03125, %v123_v42  ;;  %1178 = vmatprep.subr.mxu1 %v1371_v6  ;;  %v1315_v50 = vpack.c.bf16 %v604_v29, %v603_v17  ;;  %v502_v7 = vlaneseq }
  0x4c   :  { %1311 = vmatprep.subr.bf16.mxu0 %v1370_v43  ;;  %v350_v5 = vsel %vm270_vm0, %v87_v35, %v69_v27 }
  0x4d   :  { %v271_v33 = vsel %vm270_vm0, %v136_v13, %v134_v34  ;;  %v503_v1 = vand.u32 127, %v502_v7  ;;  %v2257_v55 = vshrl.u32 %v502_v7, 7 }
  0x4e   :  { %419 = vmatmul.mubr.f32.vlgmr.msra.gmra.mrb[0].mxu0 %v350_v5  ;;  %340 = vmatmul.mubr.f32.vlgmr.msra.gmra.mrb[0].mxu1 %v271_v33 }
  0x4f   :  { %1313 = vmatpush3.bf16.msra.mxu0 %v1312_v12  ;;  %1175 = vmatprep.mubr.msk.f32.mxu0 %vm1372_vm1, %v1371_v6  ;;  %v508_v44 = vadd.s32 4294967288, %v503_v1  ;;  %v515_v45 = vadd.s32 4294967280, %v503_v1  ;;  %v522_v57 = vadd.s32 4294967272, %v503_v1  ;;  %v506_v15 = vsub.s32 %v503_v1, %v2257_v55 }
  0x50   :  { %1314 = vmatprep.subr.bf16.mxu0 %v1370_v43  ;;  %1180 = vmatprep.mubr.msk.f32.mxu1 %vm1372_vm1, %v1371_v6 }
  0x51   :  { %v511_v2 = vsub.s32 %v508_v44, %v2257_v55  ;;  %v518_v58 = vsub.s32 %v515_v45, %v2257_v55  ;;  %v525_v24 = vsub.s32 %v522_v57, %v2257_v55 }
  0x53   :  { %1316 = vmatpush3.bf16.msra.mxu0 %v1315_v50 }
  0x91   :  { %v451_v51 = vpop.xlane.xlu1 %450 }
  0x92   :  { %v439_v18 = vpop.xlane.xlu0 %438  ;;  %v466_v59 = vmul.f32 0.00390625, %v451_v51 }
  0x93   :  { %v462_v60 = vmul.f32 0.00390625, %v439_v18 }
  0x94   :  { %v532_v16 = vrot.slane %v466_v59, %v506_v15 }
  0x95   :  { %v454_v19 = vpop.xlane.xlu1 %453  ;;  %v507_v21 = vrot.slane %v462_v60, %v506_v15 }
  0x96   :  { %v442_v20 = vpop.xlane.xlu0 %441  ;;  %v467_v40 = vmul.f32 0.00390625, %v454_v19 }
  0x97   :  { %v463_v61 = vmul.f32 0.00390625, %v442_v20 }
  0x98   :  { %v536_v11 = vrot.slane %v467_v40, %v511_v2 }
  0x99   :  { %v457_v26 = vpop.xlane.xlu1 %456  ;;  %v512_v47 = vrot.slane %v463_v61, %v511_v2 }
  0x9a   :  { %v445_v0 = vpop.xlane.xlu0 %444  ;;  %v468_v62 = vmul.f32 0.00390625, %v457_v26  ;;  %v537_v43 = vsel %vm513_vm2, %v536_v11, %v532_v16 }
  0x9b   :  { %v464_v9 = vmul.f32 0.00390625, %v445_v0  ;;  %v514_v29 = vsel %vm513_vm2, %v512_v47, %v507_v21 }
  0x9c   :  { %v541_v22 = vrot.slane %v468_v62, %v518_v58 }
  0x9d   :  { %v460_v38 = vpop.xlane.xlu1 %459  ;;  %v519_v42 = vrot.slane %v464_v9, %v518_v58 }
  0x9e   :  { %v448_v54 = vpop.xlane.xlu0 %447  ;;  %v469_v30 = vmul.f32 0.00390625, %v460_v38  ;;  %v542_v5 = vsel %vm520_vm3, %v541_v22, %v537_v43 }
  0x9f   :  { %v465_v10 = vmul.f32 0.00390625, %v448_v54  ;;  %v521_v50 = vsel %vm520_vm3, %v519_v42, %v514_v29  ;;  %v903_v29 = vld [vmem:[%s2441_s7] sm:$0xff] }
  0xa0   :  { %v546_v27 = vrot.slane %v469_v30, %v525_v24 }
  0xa1   :  { %v475_v56 = vpop.xlane.xlu1 %474  ;;  %v526_v34 = vrot.slane %v465_v10, %v525_v24 }
  0xa2   :  { %v472_v14 = vpop.xlane.xlu0 %471  ;;  %v565_v35 = vrot.slane %v475_v56, %v511_v2  ;;  %v547_v51 = vsel %vm527_vm4, %v546_v27, %v542_v5  ;;  %v904_v5 = vld [vmem:[%s2441_s7 + $0x8] sm:$0xff] }
  0xa3   :  { %v561_v12 = vrot.slane %v472_v14, %v506_v15  ;;  %v528_v26 = vsel %vm527_vm4, %v526_v34, %v521_v50  ;;  %v680_v14 = vld [vmem:[%s2440_s5] sm:$0x3]  ;;  %v795_v34 = vsub.s32 0, %v2257_v55  ;;  %v906_v50 = vld [vmem:[%s2441_s7 + $0x18] sm:$0xff] }
  0xa4   :  { %v548_v56 = vsel %vm270_vm0, %v547_v51, %v528_v26  ;;  %1179 = vmatpush3.msk.msra.mxu1 %vm599_vm6, %v680_v14  ;;  %v1374_v51 = vmov 1966171168  }
  0xa5   :  { %v487_v39 = vpop.xlane.xlu1 %486  ;;  %v566_v7 = vsel %vm513_vm2, %v565_v35, %v561_v12 }
  0xa6   :  { %v484_v46 = vpop.xlane.xlu0 %483  ;;  %v584_v28 = vrot.slane %v487_v39, %v511_v2 }
  0xa7   :  { %v580_v48 = vrot.slane %v484_v46, %v506_v15 }
  0xa9   :  { %v490_v23 = vpop.xlane.xlu1 %489  ;;  %v585_v18 = vsel %vm513_vm2, %v584_v28, %v580_v48 }
  0xaa   :  { %v478_v49 = vpop.xlane.xlu0 %477  ;;  %v589_v13 = vrot.slane %v490_v23, %v518_v58 }
  0xab   :  { %v570_v17 = vrot.slane %v478_v49, %v518_v58 }
  0xac   :  { %v590_v0 = vsel %vm520_vm3, %v589_v13, %v585_v18  ;;  %v799_v13 = vsub.s32 1, %v2257_v55  ;;  %v772_v18 = vunpack.c.l.s4 %v1374_v51 }
  0xad   :  { %v493_v33 = vpop.xlane.xlu1 %492  ;;  %v571_v1 = vsel %vm520_vm3, %v570_v17, %v566_v7  ;;  %v1373_v17 = vmov 0  }
  0xae   :  { %v594_v19 = vrot.slane %v493_v33, %v525_v24  ;;  %v481_v20 = vpop.xlane.xlu0 %480  ;;  %1340 = vset.pattern.permute.xlu0 %v1373_v17  ;;  %1341 = vset.pattern.permute.xlu1 %v1373_v17  ;;  %v905_v33 = vld [vmem:[%s2441_s7 + $0x10] sm:$0xff] }
  0xaf   :  { %v575_v38 = vrot.slane %v481_v20, %v525_v24 }
  0xb0   :  { %v595_v54 = vsel %vm527_vm4, %v594_v19, %v590_v0  ;;  %v773_v19 = vunpack.c.0.s8 %v772_v18  ;;  %v1365_v18 = vld [vmem:[%s2435_s0 + $0x38] sm:$0xff] }
  0xb1   :  { %v576_v44 = vsel %vm527_vm4, %v575_v38, %v571_v1 }
  0xb2   :  { %v597_v45 = vsel %vm596_vm5, %v595_v54, %v576_v44  ;;  %v776_v20 = vsub.s32 %v773_v19, %v2257_v55  ;;  %v1354_v44 = vld [vmem:[%s2435_s0 + $0x10] sm:$0xff]  ;;  %v1356_v55 = vld [vmem:[%s2435_s0] sm:$0xff] }
  0xb3   :  { %v600_v57 = vsel %vm599_vm6, %v548_v56, %v597_v45  ;;  %v1355_v56 = vld [vmem:[%s2435_s0 + $0x18] sm:$0xff] }
  0xb4   :  { %1176 = vmatmul.mubr.msk.f32.vlgmr.msra.gmra.mrb[2].mxu0 %vm605_vm7, %v600_v57 }
  0xb5   :  { %1003 = vmatprep.mubr.f32.mxu0 %v1371_v6 }
 0x121   :  { %v420_v15 = vpop.f32.mrb[0].mxu0  ;;  %v341_v2 = vpop.f32.mrb[0].mxu1 }
 0x122   :  { %v422_v40 = vpop.f32.mrb[1].mxu0  ;;  %v421_v58 = vadd.f32 %v420_v15, %v341_v2  ;;  %v343_v59 = vpop.f32.mrb[1].mxu1  ;;  %v1357_v2 = vld [vmem:[%s2435_s0 + $0x8] sm:$0xff] }
 0x123   :  { %v423_v60 = vadd.f32 %v422_v40, %v343_v59 }
 0x124   :  { %v1138_v61 = vmul.f32 -1.442695, %v421_v58 }
 0x125   :  { %v1139_v62 = vmul.f32 -1.442695, %v423_v60 }
 0x126   :  { %1342 = vpow2.f32 %v1138_v61 }
 0x127   :  { %1344 = vpow2.f32 %v1139_v62 }
 0x130   :  { %v1343_v39 = vpop.eup %1342 }
 0x131   :  { %v1345_v9 = vpop.eup %1344  ;;  %v431_v24 = vadd.f32 1.0, %v1343_v39 }
 0x132   :  { %v432_v30 = vadd.f32 1.0, %v1345_v9 }
 0x133   :  { %1346 = vrcp.f32 %v431_v24 }
 0x134   :  { %1348 = vrcp.f32 %v432_v30 }
 0x13d   :  { %v1347_v46 = vpop.eup %1346 }
 0x13e   :  { %v1349_v10 = vpop.eup %1348 }
 0x13f   :  { %v770_v11 = vcombine.low %v1347_v46, %v1349_v10 }
 0x141   :  { %v777_v26 = vrot.slane %v770_v11, %v776_v20 }
 0x143   :  { %v785_v7 = vrot.slane %v777_v26, %v776_v20  ;;  %v778_v0 = vcombine.high %v777_v26, %v777_v26 }
 0x145   :  { %v796_v38 = vrot.slane %v785_v7, %v795_v34  ;;  %v800_v1 = vrot.slane %v785_v7, %v799_v13  ;;  %v792_v54 = vrot.slane %v778_v0, %v776_v20  ;;  %v2469_v0 = vld [vmem:[#allocation3_spill] sm:$0xff] }
 0x147   :  { %v815_v45 = vmul.f32 %v1354_v44, %v796_v38  ;;  %v816_v57 = vmul.f32 %v1355_v56, %v800_v1  ;;  %v813_v15 = vmul.f32 %v1356_v55, %v796_v38  ;;  %v814_v40 = vmul.f32 %v1357_v2, %v800_v1 }
 0x148   :  { %v804_v46 = vrot.slane %v792_v54, %v795_v34  ;;  %v808_v10 = vrot.slane %v792_v54, %v799_v13  ;;  %v820_v19 = vmul.f32 %v1365_v18, %v800_v1 }
 0x187   :  { %v675_v16 = vpop.f32.mrb[2].mxu0 }
 0x188   :  { %v679_v21 = vmax.f32 %v675_v16, 0.0  ;;  %v1177_v47 = vpop.f32.mrb[3].mxu0 }
 0x18a   :  { %1181 = vmatmul.mubr.msk.f32.vlgmr.msra.gmra.mrb[2].mxu1 %vm681_vm8, %v679_v21 }
 0x18b   :  { %1100 = vmatprep.mubr.f32.mxu1 %v1371_v6 }
 0x25d   :  { %v754_v22 = vpop.f32.mrb[2].mxu1 }
 0x25e   :  { %v759_v23 = vrot.slane %v754_v22, 2  ;;  %v1182_v42 = vpop.f32.mrb[3].mxu1 }
 0x260   :  { %v761_v27 = vadd.f32 %v759_v23, %v754_v22 }
 0x262   :  { %v1143_v28 = vmul.f32 -1.442695, %v761_v27  ;;  %v1360_v27 = vld [vmem:[%s2435_s0 + $0x50] sm:$0xff] }
 0x264   :  { %1350 = vpow2.f32 %v1143_v28  ;;  %v823_v28 = vmul.f32 %v1360_v27, %v804_v46 }
 0x26e   :  { %v1351_v48 = vpop.eup %1350 }
 0x26f   :  { %v765_v49 = vadd.f32 1.0, %v1351_v48 }
 0x271   :  { %1352 = vrcp.f32 %v765_v49 }
 0x27b   :  { %v1353_v35 = vpop.eup %1352 }
 0x27c   :  { %v832_v12 = vrot.slane %v1353_v35, %v795_v34  ;;  %v851_v43 = vrot.slane %v1353_v35, %v799_v13  ;;  %v2468_v35 = vld [vmem:[#allocation2_spill] sm:$0xff] }
 0x27e   :  { %838 = vbcast.lane.b32.xlu1 %v832_v12, 264  ;;  %834 = vbcast.lane.b32.xlu0 %v832_v12, 256 }
 0x282   :  { %853 = vbcast.lane.b32.xlu1 %v851_v43, 256  ;;  %842 = vbcast.lane.b32.xlu0 %v832_v12, 272 }
 0x286   :  { %857 = vbcast.lane.b32.xlu1 %v851_v43, 264  ;;  %861 = vbcast.lane.b32.xlu0 %v851_v43, 272 }
 0x28a   :  { %846 = vbcast.lane.b32.xlu1 %v832_v12, 280  ;;  %909 = vperm.xlu0 %1340, %v903_v29  }
 0x28e   :  { %865 = vbcast.lane.b32.xlu1 %v851_v43, 280  ;;  %924 = vperm.xlu0 %1340, %v906_v50  }
 0x292   :  { %914 = vperm.xlu1 %1341, %v904_v5   ;;  %v1362_v5 = vld [vmem:[%s2435_s0 + $0x20] sm:$0xff] }
 0x296   :  { %919 = vperm.xlu1 %1341, %v905_v33   ;;  %v817_v33 = vmul.f32 %v1362_v5, %v796_v38 }
 0x2f0   :  { %v839_v14 = vpop.permute.xlu1 %838  ;;  %v835_v58 = vpop.permute.xlu0 %834 }
 0x2f1   :  { %v869_v59 = vmul.f32 %v839_v14, %v2130_v32  ;;  %v870_v60 = vmul.f32 %v839_v14, %v2072_v37  ;;  %v867_v61 = vmul.f32 %v835_v58, %v2116_v63  ;;  %v868_v62 = vmul.f32 %v835_v58, %v2067_v36  ;;  %v1358_v37 = vld [vmem:[%s2435_s0 + $0x40] sm:$0xff]  ;;  %v1359_v36 = vld [vmem:[%s2435_s0 + $0x48] sm:$0xff]  ;;  %v2470_v14 = vld [vmem:[#allocation4_spill] sm:$0xff] }
 0x2f2   :  { %v821_v63 = vmul.f32 %v1358_v37, %v804_v46  ;;  %v822_v23 = vmul.f32 %v1359_v36, %v808_v10  ;;  %v902_v37 = vld [vmem:[%s2442_s6 + $0x18] sm:$0xff] }
 0x2f3   :  { %v885_v39 = vadd.f32 %v869_v59, %v815_v45  ;;  %v886_v9 = vadd.f32 %v870_v60, %v816_v57  ;;  %v883_v24 = vadd.f32 %v867_v61, %v813_v15  ;;  %v884_v30 = vadd.f32 %v868_v62, %v814_v40  ;;  %v1369_v59 = vld [vmem:[%s2435_s0 + $0x78] sm:$0xff] }
 0x2f4   :  { %v854_v11 = vpop.permute.xlu1 %853  ;;  %v843_v21 = vpop.permute.xlu0 %842  ;;  %v828_v60 = vmul.f32 %v1369_v59, %v808_v10 }
 0x2f5   :  { %v1319_v16 = vpack.c.bf16 %v885_v39, %v883_v24  ;;  %v1317_v47 = vpack.c.bf16 %v886_v9, %v884_v30  ;;  %v875_v22 = vmul.f32 %v854_v11, %v2142_v53  ;;  %v876_v32 = vmul.f32 %v854_v11, %v2086_v41  ;;  %v1361_v41 = vld [vmem:[%s2435_s0 + $0x58] sm:$0xff] }
 0x2f6   :  { %v824_v53 = vmul.f32 %v1361_v41, %v808_v10  ;;  %v871_v34 = vmul.f32 %v843_v21, %v2135_v3  ;;  %v872_v12 = vmul.f32 %v843_v21, %v2468_v35  ;;  %v1364_v3 = vld [vmem:[%s2435_s0 + $0x30] sm:$0xff]  ;;  %v2471_v9 = vld [vmem:[#allocation5_spill] sm:$0xff] }
 0x2f7   :  { %1318 = vmatprep.subr.bf16.mxu0 %v1317_v47  ;;  %v891_v13 = vadd.f32 %v875_v22, %v821_v63  ;;  %v892_v43 = vadd.f32 %v876_v32, %v822_v23  ;;  %v819_v51 = vmul.f32 %v1364_v3, %v796_v38 }
 0x2f8   :  { %v858_v42 = vpop.permute.xlu1 %857  ;;  %1320 = vmatpush1.bf16.msra.mxu0 %v1319_v16  ;;  %v887_v45 = vadd.f32 %v871_v34, %v817_v33 }
 0x2f9   :  { %v877_v48 = vmul.f32 %v858_v42, %v2147_v25  ;;  %v878_v49 = vmul.f32 %v858_v42, %v2091_v52  ;;  %v1363_v25 = vld [vmem:[%s2435_s0 + $0x28] sm:$0xff]  ;;  %v862_v52 = vpop.permute.xlu0 %861 }
 0x2fa   :  { %v818_v50 = vmul.f32 %v1363_v25, %v800_v1  ;;  %v879_v57 = vmul.f32 %v862_v52, %v2152_v31  ;;  %v880_v55 = vmul.f32 %v862_v52, %v2470_v14  ;;  %v1366_v1 = vld [vmem:[%s2435_s0 + $0x60] sm:$0xff]  ;;  %v1368_v31 = vld [vmem:[%s2435_s0 + $0x70] sm:$0xff] }
 0x2fb   :  { %v893_v17 = vadd.f32 %v877_v48, %v823_v28  ;;  %v894_v29 = vadd.f32 %v878_v49, %v824_v53  ;;  %v825_v2 = vmul.f32 %v1366_v1, %v804_v46  ;;  %v827_v58 = vmul.f32 %v1368_v31, %v804_v46  ;;  %v899_v46 = vld [vmem:[%s2442_s6] sm:$0xff] }
 0x2fc   :  { %v847_v20 = vpop.permute.xlu1 %846  ;;  %v888_v56 = vadd.f32 %v872_v12, %v818_v50 }
 0x2fd   :  { %v1327_v26 = vpack.c.bf16 %v893_v17, %v891_v13  ;;  %v873_v7 = vmul.f32 %v847_v20, %v2163_v4  ;;  %v874_v54 = vmul.f32 %v847_v20, %v2469_v0  ;;  %v1325_v44 = vpack.c.bf16 %v894_v29, %v892_v43  ;;  %v1367_v4 = vld [vmem:[%s2435_s0 + $0x68] sm:$0xff] }
 0x2fe   :  { %v826_v40 = vmul.f32 %v1367_v4, %v808_v10  ;;  %v895_v11 = vadd.f32 %v879_v57, %v825_v2  ;;  %v901_v10 = vld [vmem:[%s2442_s6 + $0x10] sm:$0xff] }
 0x2ff   :  { %v889_v15 = vadd.f32 %v873_v7, %v819_v51  ;;  %v890_v38 = vadd.f32 %v874_v54, %v820_v19  ;;  %1326 = vmatprep.subr.bf16.mxu1 %v1325_v44 }
 0x300   :  { %1328 = vmatpush1.bf16.msra.mxu1 %v1327_v26  ;;  %v866_v61 = vpop.permute.xlu1 %865  ;;  %v896_v16 = vadd.f32 %v880_v55, %v826_v40 }
 0x301   :  { %v1323_v62 = vpack.c.bf16 %v889_v15, %v887_v45  ;;  %v881_v39 = vmul.f32 %v866_v61, %v2180_v8  ;;  %v882_v24 = vmul.f32 %v866_v61, %v2471_v9  ;;  %v1321_v30 = vpack.c.bf16 %v890_v38, %v888_v56  ;;  %v900_v8 = vld [vmem:[%s2442_s6 + $0x8] sm:$0xff] }
 0x303   :  { %v897_v21 = vadd.f32 %v881_v39, %v827_v58  ;;  %v898_v47 = vadd.f32 %v882_v24, %v828_v60  ;;  %1322 = vmatprep.subr.bf16.mxu0 %v1321_v30 }
 0x304   :  { %1324 = vmatpush1.bf16.msra.mxu0 %v1323_v62 }
 0x305   :  { %v1331_v22 = vpack.c.bf16 %v897_v21, %v895_v11  ;;  %v1329_v32 = vpack.c.bf16 %v898_v47, %v896_v16 }
 0x307   :  { %1144 = vmatmul.mubr.msk.f32.vlgmr.msra.gmra.mrb[4].mxu0 %vm605_vm7, %v899_v46  ;;  %1330 = vmatprep.subr.bf16.mxu1 %v1329_v32 }
 0x308   :  { %1332 = vmatpush1.bf16.msra.mxu1 %v1331_v22  ;;  %1009 = vmatprep.mubr.f32.mxu0 %v1371_v6 }
 0x309   :  { %v910_v63 = vpop.permute.xlu0 %909 }
 0x30b   :  { %1145 = vmatmul.mubr.msk.f32.gmra.mrb[6].mxu0 %vm605_vm7, %v900_v8  ;;  %1148 = vmatmul.mubr.msk.f32.vlgmr.msra.gmra.mrb[4].mxu1 %vm605_vm7, %v899_v46 }
 0x30c   :  { %1015 = vmatprep.mubr.f32.mxu0 %v1371_v6  ;;  %1106 = vmatprep.mubr.f32.mxu1 %v1371_v6 }
 0x30d   :  { %v925_v3 = vpop.permute.xlu0 %924 }
 0x30f   :  { %1146 = vmatmul.mubr.msk.f32.gmra.mrb[8].mxu0 %vm605_vm7, %v901_v10  ;;  %1149 = vmatmul.mubr.msk.f32.gmra.mrb[6].mxu1 %vm605_vm7, %v900_v8 }
 0x310   :  { %1021 = vmatprep.mubr.f32.mxu0 %v1371_v6  ;;  %1112 = vmatprep.mubr.f32.mxu1 %v1371_v6 }
 0x311   :  { %v915_v23 = vpop.permute.xlu1 %914 }
 0x313   :  { %1147 = vmatmul.mubr.msk.f32.gmra.mrb[10].mxu0 %vm605_vm7, %v902_v37  ;;  %1150 = vmatmul.mubr.msk.f32.gmra.mrb[8].mxu1 %vm605_vm7, %v901_v10 }
 0x314   :  { %1118 = vmatprep.mubr.f32.mxu1 %v1371_v6 }
 0x315   :  { %v920_v13 = vpop.permute.xlu1 %919 }
 0x317   :  { %1151 = vmatmul.mubr.msk.f32.gmra.mrb[10].mxu1 %vm605_vm7, %v902_v37 }
 0x3da   :  { %v1005_v36 = vpop.f32.mrb[4].mxu0 }
 0x3db   :  { %v1006_v42 = vadd.f32 %v1005_v36, %v910_v63  ;;  %v1007_v27 = vpop.f32.mrb[5].mxu0 }
 0x3dc   :  { %v1008_v28 = vadd.f32 %v1007_v27, %v910_v63 }
 0x3dd   :  { %1028 = vst [vmem:[%s2443_s8] sm:$0xff] %v1006_v42 }
 0x3de   :  { %1029 = vst [vmem:[%s2443_s8 + $0x8] sm:$0xff] %v1008_v28  ;;  %v1102_v41 = vpop.f32.mrb[4].mxu1  ;;  %v1011_v53 = vpop.f32.mrb[6].mxu0 }
 0x3df   :  { %v1103_v48 = vadd.f32 %v1102_v41, %v910_v63  ;;  %v1104_v6 = vpop.f32.mrb[5].mxu1  ;;  %v1012_v49 = vadd.f32 %v1011_v53, %v915_v23  ;;  %v1013_v34 = vpop.f32.mrb[7].mxu0 }
 0x3e0   :  { %v1105_v35 = vadd.f32 %v1104_v6, %v910_v63  ;;  %v1014_v12 = vadd.f32 %v1013_v34, %v915_v23 }
 0x3e1   :  { %1152 = vst [vmem:[%s2443_s8 + $0x40] sm:$0xff] %v1103_v48  ;;  %1030 = vst [vmem:[%s2443_s8 + $0x10] sm:$0xff] %v1012_v49 }
 0x3e2   :  { %1153 = vst [vmem:[%s2443_s8 + $0x48] sm:$0xff] %v1105_v35  ;;  %1031 = vst [vmem:[%s2443_s8 + $0x18] sm:$0xff] %v1014_v12  ;;  %v1108_v43 = vpop.f32.mrb[6].mxu1  ;;  %v1017_v17 = vpop.f32.mrb[8].mxu0 }
 0x3e3   :  { %v1109_v29 = vadd.f32 %v1108_v43, %v915_v23  ;;  %v1110_v5 = vpop.f32.mrb[7].mxu1  ;;  %v1019_v33 = vpop.f32.mrb[9].mxu0  ;;  %v1018_v25 = vadd.f32 %v1017_v17, %v920_v13 }
 0x3e4   :  { %v1111_v50 = vadd.f32 %v1110_v5, %v915_v23  ;;  %v1020_v52 = vadd.f32 %v1019_v33, %v920_v13 }
 0x3e5   :  { %1154 = vst [vmem:[%s2443_s8 + $0x50] sm:$0xff] %v1109_v29  ;;  %1032 = vst [vmem:[%s2443_s8 + $0x20] sm:$0xff] %v1018_v25 }
 0x3e6   :  { %1155 = vst [vmem:[%s2443_s8 + $0x58] sm:$0xff] %v1111_v50  ;;  %1033 = vst [vmem:[%s2443_s8 + $0x28] sm:$0xff] %v1020_v52  ;;  %v1023_v51 = vpop.f32.mrb[10].mxu0  ;;  %v1114_v18 = vpop.f32.mrb[8].mxu1 }
 0x3e7   :  { %v1115_v19 = vadd.f32 %v1114_v18, %v920_v13  ;;  %v1024_v20 = vadd.f32 %v1023_v51, %v925_v3  ;;  %v1025_v26 = vpop.f32.mrb[11].mxu0  ;;  %v1116_v7 = vpop.f32.mrb[9].mxu1 }
 0x3e8   :  { %v1026_v0 = vadd.f32 %v1025_v26, %v925_v3  ;;  %v1117_v54 = vadd.f32 %v1116_v7, %v920_v13 }
 0x3e9   :  { %1156 = vst [vmem:[%s2443_s8 + $0x60] sm:$0xff] %v1115_v19  ;;  %1034 = vst [vmem:[%s2443_s8 + $0x30] sm:$0xff] %v1024_v20 }
 0x3ea   :  { %1035 = vst [vmem:[%s2443_s8 + $0x38] sm:$0xff] %v1026_v0  ;;  %1157 = vst [vmem:[%s2443_s8 + $0x68] sm:$0xff] %v1117_v54  ;;  %v1120_v44 = vpop.f32.mrb[10].mxu1 }
 0x3eb   :  { %v1121_v45 = vadd.f32 %v1120_v44, %v925_v3  ;;  %v1122_v56 = vpop.f32.mrb[11].mxu1 }
 0x3ec   :  { %v1123_v57 = vadd.f32 %v1122_v56, %v925_v3 }
 0x3ed   :  { %1158 = vst [vmem:[%s2443_s8 + $0x70] sm:$0xff] %v1121_v45 }
 0x3ee   :  { %1159 = vst [vmem:[%s2443_s8 + $0x78] sm:$0xff] %v1123_v57 }

</bundles_post_ra>
